<compile_context>
chip_gen: v6e
topology: v6e:2x2x1
jax: 0.10.0
libtpu: 0.0.40
codegen_flags: <defaults>
</compile_context>

<pallas_src>
import math
import functools

import jax
import jax.numpy as jnp
from jax.experimental import pallas as pl
from jax.experimental.pallas import tpu as pltpu

LOG_2PI = math.log(2.0 * math.pi)
LOG_K = math.log(2.0 ** 8)   # k = 256 discrete values per dim
LOG_2 = math.log(2.0)
_LANES = 128


def _round_up(x, m):
    return ((x + m - 1) // m) * m


def _nll_single_kernel(z_ref, sldj_ref, nll_ref, *, const):
    """Whole problem fits one VMEM block. z_ref: (B, rows, 128); sldj/nll: (B, 1)."""
    z = z_ref[...].astype(jnp.float32)
    s = jnp.sum(z * z, axis=2, keepdims=True)        # (B, rows, 1) — single lane reduce
    sumsq = jnp.sum(s, axis=1)                       # (B, 1)
    # nll = -(prior_ll + sldj) = 0.5*sum(z^2) + (0.5*log(2pi) + log(k))*dim - sldj
    nll_ref[...] = 0.5 * sumsq + const - sldj_ref[...].astype(jnp.float32)


def _nll_tiled_kernel(z_ref, sldj_ref, nll_ref, acc_ref, *, const):
    """Grid: (batch blocks ["parallel"], D-row tiles ["arbitrary"]).

    acc_ref : (bb, 8, 128) f32 lane/sublane-dense running sum of z^2.
    """
    j = pl.program_id(1)

    @pl.when(j == 0)
    def _():
        acc_ref[...] = jnp.zeros_like(acc_ref)

    z = z_ref[...].astype(jnp.float32)               # (bb, R, 128), R % 8 == 0
    bb, rows, lanes = z.shape
    z2 = (z * z).reshape(bb, rows // 8, 8, lanes)
    acc_ref[...] += jnp.sum(z2, axis=1)              # elementwise vreg adds (VPU only)

    @pl.when(j == pl.num_programs(1) - 1)
    def _():
        acc = acc_ref[...]
        s = jnp.sum(acc, axis=2, keepdims=True)      # (bb, 8, 1) — one lane reduce total
        sumsq = jnp.sum(s, axis=1)                   # (bb, 1)
        nll_ref[...] = 0.5 * sumsq + const - sldj_ref[...].astype(jnp.float32)


def nll_loss(z, sldj, *, target_block_bytes=2 << 20):
    """Returns (nll_mean, bpd_mean) as scalar float32 values."""
    B = z.shape[0]
    dim = 1
    for s in z.shape[1:]:
        dim *= s

    z_flat = jnp.reshape(z, (B, dim))                # keep native dtype (bf16/f32/...)
    sldj_col = jnp.reshape(sldj, (B, 1))

    itemsize = jnp.dtype(z_flat.dtype).itemsize
    const = (0.5 * LOG_2PI + LOG_K) * dim            # applied once in finalize

    # Batch blocking: give v7x's two TensorCores a "parallel" axis when B allows,
    # and bound block size for very large B.
    b_block = B
    if B >= 16 and B % 16 == 0:
        b_block = B // 2
    while b_block % 16 == 0 and b_block * 8 * _LANES * itemsize > target_block_bytes:
        b_block //= 2
    num_b_blocks = B // b_block

    # Sublane-dense row tiling of the flattened per-sample axis: rows x 128 lanes.
    rows = _round_up(pl.cdiv(dim, _LANES), 8)
    target_rows = max(8, (target_block_bytes // (b_block * _LANES * itemsize)) // 8 * 8)
    block_rows = min(target_rows, rows)
    rows_pad = _round_up(rows, block_rows)
    num_d_tiles = rows_pad // block_rows

    pad = rows_pad * _LANES - dim
    if pad:
        z_flat = jnp.pad(z_flat, ((0, 0), (0, pad)))  # zeros contribute 0 to sum(z^2)
    z3 = jnp.reshape(z_flat, (B, rows_pad, _LANES))

    if num_d_tiles == 1 and num_b_blocks == 1:
        # Tiny/small input: single block, no grid, no accumulator, no branches.
        nll_per_sample = pl.pallas_call(
            functools.partial(_nll_single_kernel, const=const),
            out_shape=jax.ShapeDtypeStruct((B, 1), jnp.float32),
        )(z3, sldj_col)
    else:
        block_bytes = b_block * block_rows * _LANES * itemsize
        vmem_limit = int(min(64 << 20, max(32 << 20, 4 * block_bytes + (4 << 20))))
        nll_per_sample = pl.pallas_call(
            functools.partial(_nll_tiled_kernel, const=const),
            out_shape=jax.ShapeDtypeStruct((B, 1), jnp.float32),
            grid_spec=pltpu.PrefetchScalarGridSpec(
                num_scalar_prefetch=0,
                grid=(num_b_blocks, num_d_tiles),
                in_specs=[
                    pl.BlockSpec((b_block, block_rows, _LANES), lambda i, j: (i, j, 0)),
                    pl.BlockSpec((b_block, 1), lambda i, j: (i, 0)),   # sldj (resident)
                ],
                out_specs=pl.BlockSpec((b_block, 1), lambda i, j: (i, 0)),
                scratch_shapes=[pltpu.VMEM((b_block, 8, _LANES), jnp.float32)],
            ),
            compiler_params=pltpu.CompilerParams(
                dimension_semantics=("parallel", "arbitrary"),
                vmem_limit_bytes=vmem_limit,
            ),
        )(z3, sldj_col)

    # Tiny final means run in JAX (enables the per-sample output / parallel batch axis).
    nll_mean = jnp.mean(nll_per_sample)
    bpd_mean = nll_mean / (LOG_2 * dim)
    return nll_mean, bpd_mean


def _reference(z, sldj):
    B = z.shape[0]
    dim = 1
    for s in z.shape[1:]:
        dim *= s
    zf = jnp.reshape(z, (B, -1)).astype(jnp.float32)
    prior_ll = jnp.sum(-0.5 * zf * zf - 0.5 * LOG_2PI, axis=-1) - LOG_K * dim
    ll = prior_ll + jnp.reshape(sldj, (B,)).astype(jnp.float32)
    nll = -ll
    return jnp.mean(nll), jnp.mean(nll / (LOG_2 * dim))


if __name__ == "__main__":
    key = jax.random.PRNGKey(0)

    # --- primary small case (matches the PyTorch module usage): z (B,C,H,W), sldj (B,) ---
    kz, ks, key = jax.random.split(key, 3)
    B, C, H, W = 2, 4, 16, 16
    z = jax.random.normal(kz, (B, C, H, W), dtype=jnp.float32)
    sldj = jax.random.normal(ks, (B,), dtype=jnp.float32) * 10.0

    nll_mean, bpd_mean = nll_loss(z, sldj)
    jax.block_until_ready((nll_mean, bpd_mean))
    ref_nll, ref_bpd = _reference(z, sldj)
    assert jnp.allclose(nll_mean, ref_nll, rtol=1e-5, atol=1e-4), (nll_mean, ref_nll)
    assert jnp.allclose(bpd_mean, ref_bpd, rtol=1e-5, atol=1e-5), (bpd_mean, ref_bpd)

    # --- exercise the tiled (multi D-tile) path with a tiny target block ---
    kz, ks, key = jax.random.split(key, 3)
    z2 = jax.random.normal(kz, (2, 8, 64, 64), dtype=jnp.float32)       # dim = 32768
    sldj2 = jax.random.normal(ks, (2,), dtype=jnp.float32) * 10.0
    nll2, bpd2 = nll_loss(z2, sldj2, target_block_bytes=64 * 1024)
    jax.block_until_ready((nll2, bpd2))
    r_nll2, r_bpd2 = _reference(z2, sldj2)
    assert jnp.allclose(nll2, r_nll2, rtol=1e-5, atol=1e-3), (nll2, r_nll2)
    assert jnp.allclose(bpd2, r_bpd2, rtol=1e-5, atol=1e-5), (bpd2, r_bpd2)

    # --- exercise the parallel batch-block path (B multiple of 16) ---
    kz, ks, key = jax.random.split(key, 3)
    z3 = jax.random.normal(kz, (32, 2, 32, 32), dtype=jnp.float32)      # dim = 2048
    sldj3 = jax.random.normal(ks, (32,), dtype=jnp.float32) * 10.0
    nll3, bpd3 = nll_loss(z3, sldj3, target_block_bytes=64 * 1024)
    jax.block_until_ready((nll3, bpd3))
    r_nll3, r_bpd3 = _reference(z3, sldj3)
    assert jnp.allclose(nll3, r_nll3, rtol=1e-5, atol=1e-3), (nll3, r_nll3)
    assert jnp.allclose(bpd3, r_bpd3, rtol=1e-5, atol=1e-5), (bpd3, r_bpd3)

    print("KERNEL_OK")
</pallas_src>

<mosaic_0001>
module attributes {stable_mosaic.version = 11 : i64} {
  func.func @_nll_single_kernel(%arg0: memref<2x8x128xf32, #tpu.memory_space<vmem>>, %arg1: memref<2x1xf32, #tpu.memory_space<vmem>>, %arg2: memref<2x1xf32, #tpu.memory_space<vmem>>) attributes {dimension_semantics = [], scalar_prefetch = 0 : i64, scratch_operands = 0 : i64, tpu.core_type = #tpu.core_type<tc>} {
    %c0 = arith.constant 0 : index
    %c0_0 = arith.constant 0 : index
    %c0_1 = arith.constant 0 : index
    %0 = vector.load %arg0[%c0, %c0_0, %c0_1] : memref<2x8x128xf32, #tpu.memory_space<vmem>>, vector<2x8x128xf32>
    %1 = arith.mulf %0, %0 : vector<2x8x128xf32>
    %cst = arith.constant dense<0.000000e+00> : vector<2x8xf32>
    %2 = vector.multi_reduction <add>, %1, %cst [2] : vector<2x8x128xf32> to vector<2x8xf32>
    %3 = vector.shape_cast %2 : vector<2x8xf32> to vector<2x8x1xf32>
    %cst_2 = arith.constant dense<0.000000e+00> : vector<2x1xf32>
    %4 = vector.multi_reduction <add>, %3, %cst_2 [1] : vector<2x8x1xf32> to vector<2x1xf32>
    %cst_3 = arith.constant 5.000000e-01 : f32
    %5 = vector.broadcast %cst_3 : f32 to vector<2x1xf32>
    %6 = arith.mulf %5, %4 : vector<2x1xf32>
    %cst_4 = arith.constant 6619.25488 : f32
    %7 = vector.broadcast %cst_4 : f32 to vector<2x1xf32>
    %8 = arith.addf %6, %7 : vector<2x1xf32>
    %c0_5 = arith.constant 0 : index
    %c0_6 = arith.constant 0 : index
    %9 = vector.load %arg1[%c0_5, %c0_6] : memref<2x1xf32, #tpu.memory_space<vmem>>, vector<2x1xf32>
    %10 = arith.subf %8, %9 : vector<2x1xf32>
    %c0_7 = arith.constant 0 : index
    %c0_8 = arith.constant 0 : index
    %11 = vector.load %arg2[%c0_7, %c0_8] : memref<2x1xf32, #tpu.memory_space<vmem>>, vector<2x1xf32>
    tpu.vector_store %arg2[%c0_7, %c0_8], %10 {strides = array<i32>} : memref<2x1xf32, #tpu.memory_space<vmem>>, vector<2x1xf32>,
    return
  }
}

</mosaic_0001>

<bundles_post_ra>
// kernel: tpu_custom_call.1
= control target key start
LH: loop header
LB: loop body
LE: loop exit
PB: predicated region body
PF: predicated region fallthrough
CT: control target
= control target key end

     0   :  { %7 = vsyncpa [#allocation3], 0  ;;  %s94_s9 = smov [#allocation2]   ;;  %s121_s0 = inlined_call_operand.hbm [shape: f32[2,8,128], index: 0, kind: input, shape index: {}]   ;;  %s122_s1 = inlined_call_operand.vmem [shape: f32[2,1], index: 1, kind: input, shape index: {}]   ;;  %s123_s2 = inlined_call_operand.vmem [shape: f32[2,1], index: 2, kind: output, shape index: {}]  }
   0x1   :  { %s13_s10 = sshll.u32 %s94_s9, 4  ;;  %s14_s10 = int_to_ptr.vmem [resolvable:$true] %s13_s10 }
   0x2   :  { %s80_s11 = scalar_lea.vmem %s14_s10, 256  ;;  %p85_p1 = scmp.lt.s32.totalorder %s14_s10, %s14_s10 }
   0x3   :  { %p81_p0 = scmp.ne.s32.totalorder %s14_s10, %s80_s11  ;;  %p86_p2 = scmp.lt.s32.totalorder %s80_s11, %s80_s11 }
   0x5   :  { %p87_p3 = por %p86_p2, %p85_p1 }
   0x7   :  { %p88_p4 = pnand %p87_p3, %p81_p0 }
   0x9   :  { %91 = shalt.err (!%p88_p4)
}
   0xa   :  { %s95_s12 = smov 128   ;;  %s96_s13 = smov 8  }
   0xb   :  { %19 = dma.hbm_to_vmem [thread:$0]  %s121_s0, 256, %s14_s10, [#allocation3], %s95_s12, %s95_s12, %s96_s13  }
   0xc   :  { %92 = dma.done.wait [#allocation3], 256  }
   0xd   :  { %93 = vsyncadd [#allocation3], 4294967040  ;;  %v26_v0 = vld [vmem:[#allocation2 + $0x8] sm:$0xff]  ;;  %v25_v1 = vld [vmem:[#allocation2] sm:$0xff]  ;;  %vm59_vm0 = vcmask 1041409   ;;  %vm62_vm1 = vcmask 1024  }
   0xe   :  { %v28_v2 = vmul.f32 %v26_v0, %v26_v0  ;;  %v27_v3 = vmul.f32 %v25_v1, %v25_v1  ;;  %v49_v14 = vld [vmem:[%s122_s1] sm:$0x3] }
   0xf   :  { %v51_v18 = vrot.slane %v49_v14, 1 }
  0x10   :  { %31 = vadd.xlane.f32.xlu0 %v28_v2 }
  0x14   :  { %29 = vadd.xlane.f32.xlu0 %v27_v3 }
  0x99   :  { %v32_v4 = vpop.xlane.xlu0 %31 }
  0x9a   :  { %v39_v5 = vrot.slane %v32_v4, 4 }
  0x9c   :  { %v40_v6 = vadd.f32 %v39_v5, %v32_v4 }
  0x9d   :  { %v30_v7 = vpop.xlane.xlu0 %29 }
  0x9e   :  { %v41_v8 = vrot.slane %v40_v6, 2  ;;  %v33_v9 = vrot.slane %v30_v7, 4 }
  0xa0   :  { %v42_v10 = vadd.f32 %v41_v8, %v40_v6  ;;  %v34_v11 = vadd.f32 %v33_v9, %v30_v7 }
  0xa2   :  { %v43_v12 = vrot.slane %v42_v10, 1  ;;  %v35_v13 = vrot.slane %v34_v11, 2 }
  0xa4   :  { %v44_v15 = vadd.f32 %v43_v12, %v42_v10  ;;  %v36_v16 = vadd.f32 %v35_v13, %v34_v11 }
  0xa6   :  { %v46_v17 = vmul.f32 0.5, %v44_v15  ;;  %v37_v19 = vrot.slane %v36_v16, 1 }
  0xa8   :  { %v48_v20 = vadd.f32 6619.255, %v46_v17  ;;  %v38_v21 = vadd.f32 %v37_v19, %v36_v16 }
  0xaa   :  { %v55_v22 = vsub.f32 %v48_v20, %v51_v18  ;;  %v45_v23 = vmul.f32 0.5, %v38_v21 }
  0xac   :  { %v47_v24 = vadd.f32 6619.255, %v45_v23  ;;  %v58_v25 = vrot.slane %v55_v22, 7 }
  0xae   :  { %v54_v26 = vsub.f32 %v47_v24, %v49_v14 }
  0xb0   :  { %v60_v27 = vsel %vm59_vm0, %v58_v25, %v54_v26 }
  0xb1   :  { %63 = vst.msk [vmem:[%s123_s2] sm:$0x3] %vm62_vm1, %v60_v27 }
  0xb2   :  { %68 = vsyncpa [#allocation3], 1 }

</bundles_post_ra>
